<compile_context>
chip_gen: v6e
topology: v6e:2x2x1
jax: 0.10.0
libtpu: 0.0.40
codegen_flags: <defaults>
</compile_context>

<pallas_src>
import jax
import jax.numpy as jnp
from jax.experimental import pallas as pl
from jax.experimental.pallas import tpu as pltpu


def _round_up(n, m):
    return -(-n // m) * m


_VMEM_LIMIT = 32 << 20   # explicit scoped-VMEM limit (v5e default is only 16 MiB)


# --------------------------------------------------------------------------- #
# Kernels
# --------------------------------------------------------------------------- #
def _make_elementwise_kernel(f):
    """Generic LambdaModule forward for a jax-traceable elementwise callable."""
    def kernel(x_ref, o_ref):
        o_ref[...] = f(x_ref[...]).astype(o_ref.dtype)
    return kernel


def _sq_linear_out1_kernel(x_ref, w_ref, b_ref, o_ref):
    """Fused (x**2) @ w.T + b for OUT == 1.

    x_ref: (TB, IN) VMEM     w_ref: (1, IN) VMEM (resident across grid)
    b_ref: (1,)     SMEM     o_ref: (1, TB) VMEM (batch on lanes -> lane-dense vst)

    A single M=1 MXU contraction does the K-reduce AND the layout change
    (batch ends up on the lane axis) in its result path — no XLU transpose,
    no (TB, IN) VPU product tile.
    """
    x = x_ref[...]
    sq = x * x                                   # the wrapped lambda (x**2)
    col = jax.lax.dot_general(
        w_ref[...], sq,
        dimension_numbers=(((1,), (1,)), ((), ())),
        preferred_element_type=jnp.float32)      # (1, TB)
    o_ref[...] = (col + b_ref[0]).astype(o_ref.dtype)


def _sq_linear_mxu_kernel(x_ref, wt_ref, b_ref, o_ref):
    """Fused (x**2) @ w.T + b for OUT > 1 (lane-dense output, MXU path).

    x_ref: (TB, IN)     wt_ref: (IN, TN)  (host-transposed torch weight tile)
    b_ref: (1, TN)      o_ref: (TB, TN)
    """
    x = x_ref[...]
    sq = x * x
    # Weight already (IN, TN): contraction hits the RHS leading dim, so no
    # per-step in-kernel weight transpose is generated.
    acc = jnp.dot(sq, wt_ref[...], preferred_element_type=jnp.float32)
    o_ref[...] = (acc + b_ref[...]).astype(o_ref.dtype)


# --------------------------------------------------------------------------- #
# Wrappers
# --------------------------------------------------------------------------- #
def lambda_module_apply(f, x, *, block_rows=512, block_cols=1024):
    """Standalone LambdaModule(f) for a jax-traceable elementwise f, tiled."""
    # TODO(synk): LambdaModule may wrap arbitrary (non-JAX-traceable) Python
    # callables; only jax-traceable elementwise functions are translated here.
    out_dtype = jax.eval_shape(f, jax.ShapeDtypeStruct((1,), x.dtype)).dtype
    orig_shape = x.shape
    itemsize = jnp.dtype(x.dtype).itemsize
    cparams = pltpu.CompilerParams(dimension_semantics=("parallel",),
                                   vmem_limit_bytes=_VMEM_LIMIT)
    kernel = _make_elementwise_kernel(f)

    # Fast path: trailing dim already lane-aligned -> no pad / no extra HBM pass.
    if x.ndim >= 2 and x.shape[-1] % 128 == 0:
        cols = x.shape[-1]
        rows = x.size // cols
        x2 = x.reshape(rows, cols)                       # leading-dim collapse only
        r = max(8, min(block_rows, (4 << 20) // (cols * itemsize)))
        r = (r // 8) * 8
        if r >= rows:
            r = rows                                     # single full block
        grid_r = pl.cdiv(rows, r)
        y2 = pl.pallas_call(
            kernel,
            out_shape=jax.ShapeDtypeStruct((rows, cols), out_dtype),
            grid=(grid_r,),
            in_specs=[pl.BlockSpec((r, cols), lambda i: (i, 0))],
            out_specs=pl.BlockSpec((r, cols), lambda i: (i, 0)),
            compiler_params=cparams,
        )(x2)
        return y2.reshape(orig_shape)

    # Fallback: flatten + lane-pad (misaligned trailing dim).  Rows are tiled
    # with a cdiv grid (ragged last block) — no row padding pass.
    flat = x.reshape(-1)
    n = flat.shape[0]
    c = min(_round_up(block_cols, 128), _round_up(n, 128))
    n_pad = _round_up(n, c)
    if n_pad != n:
        flat = jnp.pad(flat, (0, n_pad - n))
    rows = n_pad // c
    r = min(block_rows, rows)
    if r < rows:
        r = max(8, (r // 8) * 8)
    grid_r = pl.cdiv(rows, r)
    x2 = flat.reshape(rows, c)
    y2 = pl.pallas_call(
        kernel,
        out_shape=jax.ShapeDtypeStruct((rows, c), out_dtype),
        grid=(grid_r,),
        in_specs=[pl.BlockSpec((r, c), lambda i: (i, 0))],
        out_specs=pl.BlockSpec((r, c), lambda i: (i, 0)),
        compiler_params=cparams,
    )(x2)
    return y2.reshape(-1)[:n].reshape(orig_shape)


def lambda_then_linear(x, w, b, *, block_b=None):
    """Docstring pipeline: Sequential(LambdaModule(x**2), Linear(IN, OUT)).

    x: (B, IN) or (IN,) float32
    w: (OUT, IN) float32   (torch.nn.Linear weight layout)
    b: (OUT,)   float32
    returns: (B, OUT) float32   (or (OUT,) for 1-D input, matching torch)
    """
    squeeze = x.ndim == 1
    if squeeze:
        x = x[None, :]
    B, IN = x.shape
    OUT = w.shape[0]
    dtype = x.dtype
    itemsize = jnp.dtype(dtype).itemsize

    # Output-feature tile (lane axis of the MXU-path output).
    if OUT == 1:
        TN = 1
        OUTP = 1
    else:
        TN = min(_round_up(OUT, 128), 1024)
        OUTP = _round_up(OUT, TN)

    # ---- batch-tile heuristic -------------------------------------------------
    if block_b is None:
        budget = 8 << 20                               # double-buffered x + out tiles
        per_row = 2 * IN * itemsize + 2 * TN * 4
        tb = max(128, budget // per_row)
        # v7x megacore: keep >= 4 batch grid steps when B allows it so the
        # "parallel" axis can shard across both TensorCores.
        tb = min(tb, max(128, _round_up(pl.cdiv(B, 4), 128)))
        TB = max(128, min(2048, (tb // 128) * 128))
    else:
        TB = max(128, _round_up(block_b, 128))         # keep lane-dense (1, TB) stores

    # No general batch pad: only tiny batches (< one tile) get a one-off pad so
    # the (8,128)-aligned block shapes remain valid.  Everything else uses a
    # cdiv grid with a ragged (masked) last block.
    if B < TB:
        x = jnp.pad(x, ((0, TB - B), (0, 0)))
        B_arr = TB
    else:
        B_arr = B
    grid_b = pl.cdiv(B_arr, TB)

    if OUT == 1:
        # Degenerate N=1 linear: single M=1 MXU contraction per tile, lane-dense
        # (1, TB) output slab (batch on lanes).  Weight row stays in its native
        # torch (1, IN) layout; bias lives in SMEM.
        out2d = pl.pallas_call(
            _sq_linear_out1_kernel,
            out_shape=jax.ShapeDtypeStruct((grid_b, TB), dtype),
            grid=(grid_b,),
            in_specs=[
                pl.BlockSpec((TB, IN), lambda i: (i, 0)),            # x tile, pipelined
                pl.BlockSpec((1, IN), lambda i: (0, 0)),             # weight row, resident
                pl.BlockSpec(memory_space=pltpu.MemorySpace.SMEM),   # bias scalar in SMEM
            ],
            out_specs=pl.BlockSpec((1, TB), lambda i: (i, 0)),       # batch on lanes
            compiler_params=pltpu.CompilerParams(
                dimension_semantics=("parallel",),
                vmem_limit_bytes=_VMEM_LIMIT),
        )(x, w, b)
        y = out2d.reshape(-1)[:B].reshape(B, 1)        # free layout plumbing -> (B, 1)
    else:
        # General path: one tiny host-side transpose of the weight to (IN, OUTP)
        # (removes per-step in-kernel weight transposes), pad OUT to a TN
        # multiple, tile both the batch and the output-feature axes.
        # TODO(synk): cast sq/w to bf16 before the dot when IN*OUT is large
        # enough to be MXU-bound (no benefit while HBM-bound, so not done here).
        if OUTP != OUT:
            w = jnp.pad(w, ((0, OUTP - OUT), (0, 0)))
            b = jnp.pad(b, (0, OUTP - OUT))
        w_t = w.T                                      # (IN, OUTP), tiny one-off
        b2 = b.reshape(1, OUTP)
        grid_n = OUTP // TN
        y_pad = pl.pallas_call(
            _sq_linear_mxu_kernel,
            out_shape=jax.ShapeDtypeStruct((B_arr, OUTP), dtype),
            grid=(grid_b, grid_n),
            in_specs=[
                pl.BlockSpec((TB, IN), lambda i, j: (i, 0)),         # x tile (held across j)
                pl.BlockSpec((IN, TN), lambda i, j: (0, j)),         # weight tile
                pl.BlockSpec((1, TN), lambda i, j: (0, j)),          # bias tile
            ],
            out_specs=pl.BlockSpec((TB, TN), lambda i, j: (i, j)),
            compiler_params=pltpu.CompilerParams(
                dimension_semantics=("parallel", "parallel"),
                vmem_limit_bytes=_VMEM_LIMIT),
        )(x, w_t, b2)
        y = y_pad[:B, :OUT]

    if squeeze:
        y = y[0]
    return y


# --------------------------------------------------------------------------- #
# Main
# --------------------------------------------------------------------------- #
if __name__ == "__main__":
    key = jax.random.PRNGKey(0)
    kx, kw, kb, kw2, kb2, kx1, kxa = jax.random.split(key, 7)

    B, IN, OUT = 512, 10, 1      # docstring example: Linear(10, 1), larger batch
    x = jax.random.normal(kx, (B, IN), dtype=jnp.float32)
    w = jax.random.normal(kw, (OUT, IN), dtype=jnp.float32) * 0.1
    b = jax.random.normal(kb, (OUT,), dtype=jnp.float32) * 0.1

    # 1) Standalone LambdaModule(lambda x: x**2), tiled elementwise kernel
    #    (misaligned trailing dim -> flatten path).
    y_sq = jax.block_until_ready(lambda_module_apply(lambda v: v * v, x))
    assert jnp.allclose(y_sq, x * x, atol=1e-6), "elementwise lambda kernel mismatch"

    # 1b) Aligned fast path (no pad / no extra HBM pass).
    xa = jax.random.normal(kxa, (2, 16, 256), dtype=jnp.float32)
    ya = jax.block_until_ready(lambda_module_apply(lambda v: v * v + 1.0, xa))
    assert jnp.allclose(ya, xa * xa + 1.0, atol=1e-6), "aligned elementwise mismatch"

    # 2) Fused Sequential(LambdaModule(x**2), Linear(10, 1)) — M=1 MXU path,
    #    block_b=128 to exercise a multi-step ("parallel") batch grid.
    y = jax.block_until_ready(lambda_then_linear(x, w, b, block_b=128))
    ref = (x * x) @ w.T + b
    assert jnp.allclose(y, ref, atol=1e-4, rtol=1e-4), "fused OUT=1 kernel mismatch"

    # 2b) Docstring-literal 1-D input: x = randn(10)
    x1 = jax.random.normal(kx1, (IN,), dtype=jnp.float32)
    y1 = jax.block_until_ready(lambda_then_linear(x1, w, b))
    ref1 = (x1 * x1) @ w.T + b
    assert jnp.allclose(y1, ref1, atol=1e-4, rtol=1e-4), "1-D input mismatch"

    # 2c) Non-TB-aligned batch (ragged last block, no host pad).
    xr = x[:300]
    yr = jax.block_until_ready(lambda_then_linear(xr, w, b))
    refr = (xr * xr) @ w.T + b
    assert jnp.allclose(yr, refr, atol=1e-4, rtol=1e-4), "ragged batch mismatch"

    # 3) Generalized wide-output version (OUT >= 128) — tiled MXU path.
    OUT2 = 128
    w2 = jax.random.normal(kw2, (OUT2, IN), dtype=jnp.float32) * 0.1
    b2 = jax.random.normal(kb2, (OUT2,), dtype=jnp.float32) * 0.1
    y2 = jax.block_until_ready(lambda_then_linear(x, w2, b2))
    ref2 = (x * x) @ w2.T + b2
    assert jnp.allclose(y2, ref2, atol=1e-3, rtol=1e-3), "fused MXU kernel mismatch"

    print("KERNEL_OK")
</pallas_src>

<mosaic_0001>
module attributes {stable_mosaic.version = 11 : i64} {
  func.func @kernel(%arg0: i32, %arg1: memref<5x1024xf32, #tpu.memory_space<vmem>>, %arg2: memref<5x1024xf32, #tpu.memory_space<vmem>>) attributes {dimension_semantics = [#tpu.dimension_semantics<parallel>], iteration_bounds = array<i64: 1>, scalar_prefetch = 0 : i64, scratch_operands = 0 : i64, tpu.core_type = #tpu.core_type<tc>, window_params = [{transform_indices = @transform_0, window_bounds = array<i64: 5, 1024>}, {transform_indices = @transform_1, window_bounds = array<i64: 5, 1024>}]} {
    %c0 = arith.constant 0 : index
    %c0_0 = arith.constant 0 : index
    %0 = vector.load %arg1[%c0, %c0_0] : memref<5x1024xf32, #tpu.memory_space<vmem>>, vector<5x1024xf32>
    %1 = arith.mulf %0, %0 : vector<5x1024xf32>
    %c0_1 = arith.constant 0 : index
    %c0_2 = arith.constant 0 : index
    %2 = vector.load %arg2[%c0_1, %c0_2] : memref<5x1024xf32, #tpu.memory_space<vmem>>, vector<5x1024xf32>
    tpu.vector_store %arg2[%c0_1, %c0_2], %1 {strides = array<i32>} : memref<5x1024xf32, #tpu.memory_space<vmem>>, vector<5x1024xf32>,
    return
  }
  func.func @transform_0(%arg0: i32) -> (i32, i32) {
    %c0_i32 = arith.constant 0 : i32
    %c0_i32_0 = arith.constant 0 : i32
    return %arg0, %c0_i32 : i32, i32
  }
  func.func @transform_1(%arg0: i32) -> (i32, i32) {
    %c0_i32 = arith.constant 0 : i32
    %c0_i32_0 = arith.constant 0 : i32
    return %arg0, %c0_i32 : i32, i32
  }
}

</mosaic_0001>

<bundles_post_ra>
// kernel: tpu_custom_call.1
= control target key start
LH: loop header
LB: loop body
LE: loop exit
PB: predicated region body
PF: predicated region fallthrough
CT: control target
= control target key end

     0   :  { %6 = vsyncpa [#allocation3], 0  ;;  %s124_s0 = inlined_call_operand.hbm [shape: f32[5,1024], index: 0, kind: input, shape index: {}]   ;;  %s125_s1 = inlined_call_operand.hbm [shape: f32[5,1024], index: 1, kind: output, shape index: {}]  }
   0x1   :  { %7 = vsyncpa [#allocation4], 0  ;;  %s106_s6 = smov [#allocation2]  }
   0x2   :  { %s14_s7 = sshll.u32 %s106_s6, 4  ;;  %s15_s7 = int_to_ptr.vmem [resolvable:$true] %s14_s7 }
   0x3   :  { %s70_s8 = scalar_lea.vmem %s15_s7, 1024  ;;  %p75_p1 = scmp.lt.s32.totalorder %s15_s7, %s15_s7 }
   0x4   :  { %p71_p0 = scmp.ne.s32.totalorder %s15_s7, %s70_s8  ;;  %p76_p2 = scmp.lt.s32.totalorder %s70_s8, %s70_s8 }
   0x6   :  { %p77_p3 = por %p76_p2, %p75_p1 }
   0x8   :  { %p78_p4 = pnand %p77_p3, %p71_p0 }
   0xa   :  { %81 = shalt.err (!%p78_p4)
}
   0xb   :  { %17 = dma.hbm_to_vmem [thread:$0]  %s124_s0, 1024, %s15_s7, [#allocation3]  }
   0xc   :  { %102 = dma.done.wait [#allocation3], 1024  }
   0xd   :  { %103 = vsyncadd [#allocation3], 4294966272  ;;  %s107_s11 = smov [#allocation5]   ;;  %v21_v0 = vld [vmem:[#allocation2] sm:$0x1f] }
   0xe   :  { %s51_s12 = sshll.u32 %s107_s11, 4  ;;  %v22_v1 = vld [vmem:[#allocation2 + $0x8] sm:$0x1f]  ;;  %v23_v2 = vld [vmem:[#allocation2 + $0x10] sm:$0x1f]  ;;  %v29_v3 = vmul.f32 %v21_v0, %v21_v0  ;;  %s52_s12 = int_to_ptr.vmem [resolvable:$true] %s51_s12 }
   0xf   :  { %v30_v4 = vmul.f32 %v22_v1, %v22_v1  ;;  %v31_v5 = vmul.f32 %v23_v2, %v23_v2  ;;  %v24_v6 = vld [vmem:[#allocation2 + $0x18] sm:$0x1f]  ;;  %v25_v7 = vld [vmem:[#allocation2 + $0x20] sm:$0x1f]  ;;  %v26_v8 = vld [vmem:[#allocation2 + $0x28] sm:$0x1f]  ;;  %p87_p6 = scmp.lt.s32.totalorder %s52_s12, %s52_s12 }
  0x10   :  { %v32_v9 = vmul.f32 %v24_v6, %v24_v6  ;;  %v33_v10 = vmul.f32 %v25_v7, %v25_v7  ;;  %v34_v11 = vmul.f32 %v26_v8, %v26_v8  ;;  %v27_v12 = vld [vmem:[#allocation2 + $0x30] sm:$0x1f]  ;;  %v28_v13 = vld [vmem:[#allocation2 + $0x38] sm:$0x1f]  ;;  %37 = vst [vmem:[#allocation5] sm:$0x1f] %v29_v3 }
  0x11   :  { %38 = vst [vmem:[#allocation5 + $0x8] sm:$0x1f] %v30_v4  ;;  %39 = vst [vmem:[#allocation5 + $0x10] sm:$0x1f] %v31_v5  ;;  %v35_v14 = vmul.f32 %v27_v12, %v27_v12  ;;  %v36_v15 = vmul.f32 %v28_v13, %v28_v13  ;;  %s82_s0 = scalar_lea.vmem %s52_s12, 1024 }
  0x12   :  { %40 = vst [vmem:[#allocation5 + $0x18] sm:$0x1f] %v32_v9  ;;  %41 = vst [vmem:[#allocation5 + $0x20] sm:$0x1f] %v33_v10  ;;  %p83_p5 = scmp.ne.s32.totalorder %s52_s12, %s82_s0  ;;  %p88_p7 = scmp.lt.s32.totalorder %s82_s0, %s82_s0 }
  0x13   :  { %42 = vst [vmem:[#allocation5 + $0x28] sm:$0x1f] %v34_v11  ;;  %43 = vst [vmem:[#allocation5 + $0x30] sm:$0x1f] %v35_v14 }
  0x14   :  { %44 = vst [vmem:[#allocation5 + $0x38] sm:$0x1f] %v36_v15  ;;  %p89_p8 = por %p88_p7, %p87_p6 }
  0x16   :  { %p90_p9 = pnand %p89_p8, %p83_p5 }
  0x18   :  { %93 = shalt.err (!%p90_p9)
}
  0x19   :  { %54 = dma.vmem_to_hbm [thread:$0]  %s52_s12, 1024, %s125_s1, [#allocation4]  }
  0x1a   :  { %104 = dma.done.wait [#allocation4], 1024  }
  0x1b   :  { %105 = vsyncadd [#allocation4], 4294966272 }
  0x1c   :  { %58 = vsyncpa [#allocation3], 1 }
  0x1d   :  { %59 = vsyncpa [#allocation4], 1 }

</bundles_post_ra>
